<compile_context>
chip_gen: v5e
topology: v5e:2x2
jax: 0.10.0
libtpu: 0.0.40
codegen_flags: <defaults>
</compile_context>

<pallas_src>
import jax
import jax.numpy as jnp
from jax.experimental import pallas as pl
from jax.experimental.pallas import tpu as pltpu


def _round_up(n, m):
    return (n + m - 1) // m * m


def _vmem_limit(est_bytes):
    """Generation-aware scoped-VMEM request: <= ~75% of physical capacity."""
    try:
        cap = pltpu.get_tpu_info().vmem_capacity_bytes  # 64 MiB v7x, 128 MiB v5e/v6e
    except Exception:  # conservative fallback if the query is unavailable
        cap = 64 << 20
    return int(min(max(2 * est_bytes, 32 << 20), int(0.75 * cap)))


def _shared_mapping_kernel(x_ref, w1_ref, b1_ref, w2_ref, b2_ref, o_ref):
    # x_ref : (tile_b, D_in)   native dtype (cast to weight dtype in-kernel)
    # w1_ref: (D_in, D_out)    bf16 (pre-cast once at init)
    # b1_ref: (1, D_out)       f32
    # w2_ref: (D_out, D_out)   bf16
    # b2_ref: (1, D_out)       f32
    # o_ref : (tile_b, D_out)
    x = x_ref[...].astype(w1_ref.dtype)                       # cast under DMA slack
    h = jnp.dot(x, w1_ref[...], preferred_element_type=jnp.float32)
    h = jnp.maximum(h + b1_ref[...], 0.0)                     # bias + ReLU in f32 (VPU)
    h = h.astype(w2_ref.dtype)                                 # bf16 operands for 2nd MXU pass
    y = jnp.dot(h, w2_ref[...], preferred_element_type=jnp.float32) + b2_ref[...]
    o_ref[...] = y.astype(o_ref.dtype)


def prepare_shared_mapping_params(w1, b1, w2, b2, compute_dtype=jnp.bfloat16):
    """One-time weight prep (do this at model init, NOT per forward call).

    w1: [D_in, D_out] (PyTorch weight transposed), b1: [D_out]
    w2: [D_out, D_out] (PyTorch weight transposed), b2: [D_out]
    """
    return (w1.astype(compute_dtype),
            b1.reshape(1, -1).astype(jnp.float32),
            w2.astype(compute_dtype),
            b2.reshape(1, -1).astype(jnp.float32))


def shared_mapping(x, w1, b1, w2, b2, *, tile_b=None, out_dtype=None):
    """Fused Linear -> ReLU -> Linear.

    x : [B, D_in]; weights ideally pre-cast via prepare_shared_mapping_params.
    Returns [B, D_out] in `out_dtype` (default x.dtype; pass jnp.bfloat16 to
    halve output writeback if the consumer tolerates it).
    """
    B, D_in = x.shape
    D_in_w, D_out = w1.shape
    assert D_in_w == D_in and w2.shape == (D_out, D_out)
    if b1.ndim == 1:
        b1 = b1.reshape(1, D_out)
    if b2.ndim == 1:
        b2 = b2.reshape(1, D_out)
    out_dtype = x.dtype if out_dtype is None else out_dtype

    # Batch tile: multiple of 8 sublanes, >= ~4 grid steps (v7x 2-TC sharding
    # + pipeline overlap), capped at 1024 and capped relative to B so awkward
    # batch sizes are not over-padded.
    if tile_b is None:
        tile_b = min(1024, _round_up(pl.cdiv(B, 4), 8))
    tile_b = max(8, _round_up(tile_b, 8))
    tile_b = min(tile_b, _round_up(B, 8))
    B_p = _round_up(B, tile_b)

    # Only batch padding (rare; <= tile_b - 1 zero rows). No feature padding,
    # no dtype-cast copy of x in HBM.
    xp = x if B_p == B else jnp.pad(x, ((0, B_p - B), (0, 0)))

    x_sz = jnp.dtype(x.dtype).itemsize
    w_sz = jnp.dtype(w1.dtype).itemsize
    o_sz = jnp.dtype(out_dtype).itemsize
    w_bytes = (D_in * D_out + D_out * D_out) * w_sz

    # VMEM budget: double-buffered x/out tiles + resident weights + biases
    # + f32 intermediates headroom (layouts pad to (8,128) tiles internally,
    # hence the 2x safety factor inside _vmem_limit).
    est_vmem = (
        2 * tile_b * D_in * x_sz
        + 2 * tile_b * D_out * o_sz
        + 2 * w_bytes
        + 4 * D_out * 4
        + 2 * tile_b * D_out * 4
    )
    vmem_limit = _vmem_limit(est_vmem)

    # Constant-index weights never change across the grid; drop their second
    # pipeline buffer once they are big enough to matter (mainly v7x 64 MiB).
    w_kwargs = {}
    if 2 * w_bytes > (8 << 20):
        w_kwargs = dict(pipeline_mode=pl.Buffered(1))

    flops = 2 * B_p * D_in * D_out + 2 * B_p * D_out * D_out
    bytes_accessed = (xp.size * x_sz + w_bytes + 2 * D_out * 4
                      + B_p * D_out * o_sz)

    out_p = pl.pallas_call(
        _shared_mapping_kernel,
        out_shape=jax.ShapeDtypeStruct((B_p, D_out), out_dtype),
        grid_spec=pltpu.PrefetchScalarGridSpec(
            num_scalar_prefetch=0,
            grid=(B_p // tile_b,),
            in_specs=[
                pl.BlockSpec((tile_b, D_in), lambda i: (i, 0)),              # x tile
                pl.BlockSpec((D_in, D_out), lambda i: (0, 0), **w_kwargs),   # w1 (resident)
                pl.BlockSpec((1, D_out), lambda i: (0, 0), **w_kwargs),      # b1
                pl.BlockSpec((D_out, D_out), lambda i: (0, 0), **w_kwargs),  # w2 (resident)
                pl.BlockSpec((1, D_out), lambda i: (0, 0), **w_kwargs),      # b2
            ],
            out_specs=pl.BlockSpec((tile_b, D_out), lambda i: (i, 0)),
        ),
        compiler_params=pltpu.CompilerParams(
            dimension_semantics=("parallel",),
            vmem_limit_bytes=vmem_limit,
        ),
        cost_estimate=pl.CostEstimate(
            flops=int(flops), transcendentals=0, bytes_accessed=int(bytes_accessed)
        ),
    )(xp, w1, b1, w2, b2)

    return out_p if B_p == B else out_p[:B]


def _reference(x, w1, b1, w2, b2, compute_dtype=jnp.bfloat16):
    # Same precision path as the kernel: bf16 operands, f32 accumulation,
    # f32 bias/ReLU epilogue.
    xb, w1b, w2b = (a.astype(compute_dtype) for a in (x, w1, w2))
    h = jnp.dot(xb, w1b, preferred_element_type=jnp.float32) + b1.astype(jnp.float32)
    h = jnp.maximum(h, 0.0).astype(compute_dtype)
    y = jnp.dot(h, w2b, preferred_element_type=jnp.float32) + b2.astype(jnp.float32)
    return y.astype(x.dtype)


if __name__ == "__main__":
    # Small shapes consistent with the module: batch=16, input_dim=32, output_dim=32.
    B, D_in, D_out = 16, 32, 32

    key = jax.random.PRNGKey(0)
    kx, k1, kb1, k2, kb2 = jax.random.split(key, 5)

    x = jax.random.normal(kx, (B, D_in), dtype=jnp.float32)

    # Deterministic param init (PyTorch nn.Linear-like uniform bounds),
    # stored pre-transposed as [in, out] for the kernel.
    bound1 = 1.0 / jnp.sqrt(D_in)
    bound2 = 1.0 / jnp.sqrt(D_out)
    w1 = jax.random.uniform(k1, (D_in, D_out), minval=-bound1, maxval=bound1,
                            dtype=jnp.float32)
    b1 = jax.random.uniform(kb1, (D_out,), minval=-bound1, maxval=bound1,
                            dtype=jnp.float32)
    w2 = jax.random.uniform(k2, (D_out, D_out), minval=-bound2, maxval=bound2,
                            dtype=jnp.float32)
    b2 = jax.random.uniform(kb2, (D_out,), minval=-bound2, maxval=bound2,
                            dtype=jnp.float32)

    # One-time weight prep (hoisted out of the per-call path).
    w1p, b1p, w2p, b2p = prepare_shared_mapping_params(w1, b1, w2, b2)

    # Default heuristic gives tile_b=8 -> a 2-step "parallel" grid even at
    # this tiny batch (exercises pipelining / megacore sharding paths).
    out = shared_mapping(x, w1p, b1p, w2p, b2p)
    out = jax.block_until_ready(out)

    ref = _reference(x, w1, b1, w2, b2)
    assert out.shape == (B, D_out)
    assert out.dtype == x.dtype
    assert jnp.allclose(out, ref, atol=2e-3, rtol=2e-3), "mismatch vs reference"

    print("KERNEL_OK")
</pallas_src>

<mosaic_0001>
module attributes {stable_mosaic.version = 11 : i64} {
  func.func @_shared_mapping_kernel(%arg0: i32, %arg1: memref<8x32xf32, #tpu.memory_space<vmem>>, %arg2: memref<32x32xbf16, #tpu.memory_space<vmem>>, %arg3: memref<1x32xf32, #tpu.memory_space<vmem>>, %arg4: memref<32x32xbf16, #tpu.memory_space<vmem>>, %arg5: memref<1x32xf32, #tpu.memory_space<vmem>>, %arg6: memref<8x32xf32, #tpu.memory_space<vmem>>) attributes {dimension_semantics = [#tpu.dimension_semantics<parallel>], iteration_bounds = array<i64: 2>, scalar_prefetch = 0 : i64, scratch_operands = 0 : i64, tpu.core_type = #tpu.core_type<tc>, window_params = [{transform_indices = @transform_0, window_bounds = array<i64: 8, 32>}, {pipeline_mode = #tpu.pipeline_mode<synchronous>, transform_indices = @transform_1, window_bounds = array<i64: 32, 32>}, {pipeline_mode = #tpu.pipeline_mode<synchronous>, transform_indices = @transform_2, window_bounds = array<i64: 1, 32>}, {pipeline_mode = #tpu.pipeline_mode<synchronous>, transform_indices = @transform_3, window_bounds = array<i64: 32, 32>}, {pipeline_mode = #tpu.pipeline_mode<synchronous>, transform_indices = @transform_4, window_bounds = array<i64: 1, 32>}, {transform_indices = @transform_5, window_bounds = array<i64: 8, 32>}]} {
    %c0 = arith.constant 0 : index
    %c0_0 = arith.constant 0 : index
    %0 = vector.load %arg1[%c0, %c0_0] : memref<8x32xf32, #tpu.memory_space<vmem>>, vector<8x32xf32>
    %1 = arith.truncf %0 : vector<8x32xf32> to vector<8x32xbf16>
    %c0_1 = arith.constant 0 : index
    %c0_2 = arith.constant 0 : index
    %2 = vector.load %arg2[%c0_1, %c0_2] : memref<32x32xbf16, #tpu.memory_space<vmem>>, vector<32x32xbf16>
    %cst = arith.constant dense<0.000000e+00> : vector<8x32xf32>
    %3 = tpu.matmul %1, %2, %cst {dimension_numbers = #tpu.dot_dimension_numbers<[1], [0], [0], [1], [0, 0, 1, 1], [], []>} : vector<8x32xbf16>, vector<32x32xbf16>, vector<8x32xf32> -> vector<8x32xf32>
    %c0_3 = arith.constant 0 : index
    %c0_4 = arith.constant 0 : index
    %4 = vector.load %arg3[%c0_3, %c0_4] : memref<1x32xf32, #tpu.memory_space<vmem>>, vector<1x32xf32>
    %5 = vector.broadcast %4 : vector<1x32xf32> to vector<8x32xf32>
    %6 = arith.addf %3, %5 : vector<8x32xf32>
    %cst_5 = arith.constant 0.000000e+00 : f32
    %7 = vector.broadcast %cst_5 : f32 to vector<8x32xf32>
    %8 = arith.maximumf %6, %7 : vector<8x32xf32>
    %9 = arith.truncf %8 : vector<8x32xf32> to vector<8x32xbf16>
    %c0_6 = arith.constant 0 : index
    %c0_7 = arith.constant 0 : index
    %10 = vector.load %arg4[%c0_6, %c0_7] : memref<32x32xbf16, #tpu.memory_space<vmem>>, vector<32x32xbf16>
    %cst_8 = arith.constant dense<0.000000e+00> : vector<8x32xf32>
    %11 = tpu.matmul %9, %10, %cst_8 {dimension_numbers = #tpu.dot_dimension_numbers<[1], [0], [0], [1], [0, 0, 1, 1], [], []>} : vector<8x32xbf16>, vector<32x32xbf16>, vector<8x32xf32> -> vector<8x32xf32>
    %c0_9 = arith.constant 0 : index
    %c0_10 = arith.constant 0 : index
    %12 = vector.load %arg5[%c0_9, %c0_10] : memref<1x32xf32, #tpu.memory_space<vmem>>, vector<1x32xf32>
    %13 = vector.broadcast %12 : vector<1x32xf32> to vector<8x32xf32>
    %14 = arith.addf %11, %13 : vector<8x32xf32>
    %c0_11 = arith.constant 0 : index
    %c0_12 = arith.constant 0 : index
    %15 = vector.load %arg6[%c0_11, %c0_12] : memref<8x32xf32, #tpu.memory_space<vmem>>, vector<8x32xf32>
    tpu.vector_store %arg6[%c0_11, %c0_12], %14 {strides = array<i32>} : memref<8x32xf32, #tpu.memory_space<vmem>>, vector<8x32xf32>,
    return
  }
  func.func @transform_0(%arg0: i32) -> (i32, i32) {
    %c0_i32 = arith.constant 0 : i32
    %c0_i32_0 = arith.constant 0 : i32
    return %arg0, %c0_i32 : i32, i32
  }
  func.func @transform_1(%arg0: i32) -> (i32, i32) {
    %c0_i32 = arith.constant 0 : i32
    %c0_i32_0 = arith.constant 0 : i32
    %c0_i32_1 = arith.constant 0 : i32
    return %c0_i32, %c0_i32_0 : i32, i32
  }
  func.func @transform_2(%arg0: i32) -> (i32, i32) {
    %c0_i32 = arith.constant 0 : i32
    %c0_i32_0 = arith.constant 0 : i32
    %c0_i32_1 = arith.constant 0 : i32
    return %c0_i32, %c0_i32_0 : i32, i32
  }
  func.func @transform_3(%arg0: i32) -> (i32, i32) {
    %c0_i32 = arith.constant 0 : i32
    %c0_i32_0 = arith.constant 0 : i32
    %c0_i32_1 = arith.constant 0 : i32
    return %c0_i32, %c0_i32_0 : i32, i32
  }
  func.func @transform_4(%arg0: i32) -> (i32, i32) {
    %c0_i32 = arith.constant 0 : i32
    %c0_i32_0 = arith.constant 0 : i32
    %c0_i32_1 = arith.constant 0 : i32
    return %c0_i32, %c0_i32_0 : i32, i32
  }
  func.func @transform_5(%arg0: i32) -> (i32, i32) {
    %c0_i32 = arith.constant 0 : i32
    %c0_i32_0 = arith.constant 0 : i32
    return %arg0, %c0_i32 : i32, i32
  }
}

</mosaic_0001>

<bundles_post_ra>
// kernel: tpu_custom_call.1
= control target key start
LH: loop header
LB: loop body
LE: loop exit
PB: predicated region body
PF: predicated region fallthrough
CT: control target
= control target key end

     0   :  { %10 = vsyncpa [#allocation3], 0  ;;  %s918_s0 = inlined_call_operand.hbm [shape: f32[16,32], index: 0, kind: input, shape index: {}]   ;;  %s919_s1 = inlined_call_operand.hbm [shape: bf16[32,32], index: 1, kind: input, shape index: {}]   ;;  %s920_s2 = inlined_call_operand.vmem [shape: f32[1,32], index: 2, kind: input, shape index: {}]   ;;  %s921_s3 = inlined_call_operand.hbm [shape: bf16[32,32], index: 3, kind: input, shape index: {}]   ;;  %s922_s4 = inlined_call_operand.vmem [shape: f32[1,32], index: 4, kind: input, shape index: {}]   ;;  %s923_s5 = inlined_call_operand.hbm [shape: f32[16,32], index: 5, kind: output, shape index: {}]  }
   0x1   :  { %12 = vsyncpa [#allocation3 + $0x1], 0 }
   0x2   :  { %13 = vsyncpa [#allocation6], 0 }
   0x3   :  { %14 = vsyncpa [#allocation4], 0 }
   0x4   :  { %16 = vsyncpa [#allocation4 + $0x1], 0  ;;  %s764_s18 = smov 0   ;;  %s766_s19 = smov 0  }
   0x5   :  { %s768_s20 = smov 0   ;;  %s770_s21 = smov 0  }
   0x6 LB: > { %s174_s24 = sshll.u32 %s919_s1, 4  ;;  %s788_s25 = sadd.s32 4294967295, %s728_s21   ;;  %s728_s21 = sphi %s770_s21, %s934_s21   ;;  %s724_s20 = sphi %s768_s20, %s933_s20   ;;  %s720_s19 = sphi %s766_s19, %s932_s19   ;;  %s716_s18 = sphi %s764_s18, %s931_s18   ;;  %s175_s24 = int_to_ptr.hbm [resolvable:$true] %s174_s24 }
   0x7   : > { %p460_p0 = scmp.ge.s32.totalorder %s728_s21, 1  ;;  %p43_p1 = scmp.eq.s32.totalorder %s788_s25, 0 }
   0x8   : > { %p163_p2 = scmp.lt.s32.totalorder %s728_s21, 3  ;;  %s730_s27 = smov [#allocation5]  }
   0x9   : > { %s176_s28 = sshll.u32 %s730_s27, 4  ;;  %s191_s6 = sshll.u32 %s921_s3, 4  ;;  %s177_s28 = int_to_ptr.vmem [resolvable:$true] %s176_s28  ;;  %s192_s6 = int_to_ptr.hbm [resolvable:$true] %s191_s6 }
   0xa   : > { %p793_p3 = pnand %p460_p0, %p163_p2  ;;  %s731_s7 = smov [#allocation7]  }
   0xb   : > { %s193_s8 = sshll.u32 %s731_s7, 4  ;;  %s732_s9 = smov 64   ;;  %s194_s8 = int_to_ptr.vmem [resolvable:$true] %s193_s8 }
   0xc   : > { %p509_p4 = pneg %p793_p3  ;;  %s733_s10 = smov 4  }
   0xd   : > { %s459_s11 = sadd.s32 4294967294, %s728_s21   ;;  %s807_s12 = sadd.s32 1, %s728_s21  }
   0xe   : > { %p510_p6 = pnand %p509_p4, %p43_p1  ;;  %s26_s13 = ssub.s32 %s728_s21, %s807_s12 }
   0xf   : > { %s29_s14 = sadd.s32 1, %s724_s20  ;;  %p27_p7 = scmp.eq.s32.totalorder %s26_s13, 0 }
  0x10   : > { %512 = dma.hbm_to_vmem [thread:$0]  (!%p510_p6), %s175_s24, 256, %s177_s28, [#allocation6], %s732_s9, %s732_s9, %s733_s10  }
  0x11   : > { %515 = dma.hbm_to_vmem [thread:$0]  (!%p510_p6), %s192_s6, 256, %s194_s8, [#allocation6], %s732_s9, %s732_s9, %s733_s10  }
  0x12   : > { %p36_p8 = scmp.ne.s32.totalorder %s724_s20, %s720_s19  ;;  %p37_p9 = scmp.eq.s32.totalorder %s728_s21, 0 }
  0x13   : > { %p42_p10 = scmp.ne.s32.totalorder %s720_s19, %s716_s18  ;;  %p150_p13 = scmp.eq.s32.totalorder %s788_s25, 1 }
  0x14   : > { %s818_s15 = scalar_select %p27_p7, %s724_s20, %s29_s14  }
  0x15   : > { %p820_p11 = por %p37_p9, %p36_p8  ;;  %p826_p12 = por %p43_p1, %p42_p10 }
  0x16   : > { %p156_p0 = scmp.eq.s32.totalorder %s459_s11, 1  ;;  %p526_p2 = scmp.lt.s32.totalorder %s728_s21, 2 }
  0x17   : > { %s210_s22 = sand.u32 1, %s724_s20   ;;  %p833_p4 = por %p150_p13, %p36_p8 }
  0x18   : > { %p837_p6 = por %p156_p0, %p42_p10  ;;  %s464_s27 = sshll.u32 %s210_s22, 3 }
  0x19   : > { %s465_s28 = sshll.u32 %s728_s21, 3  ;;  %s214_s7 = scalar_lea.vmem [#allocation2], %s464_s27 }
  0x1a   : > { %s218_s6 = scalar_lea.hbm %s918_s0, %s465_s28  ;;  %s222_s8 = sshll.u32 %s214_s7, 4  ;;  %s223_s8 = int_to_ptr.vmem [resolvable:$true] %s222_s8 }
  0x1b   : > { %s220_s9 = sshll.u32 %s218_s6, 4  ;;  %p847_p7 = pnand %p526_p2, %p820_p11  ;;  %s221_s9 = int_to_ptr.hbm [resolvable:$true] %s220_s9 }
  0x1c   : > { %s211_s11 = scalar_lea.sflag [#allocation3], %s210_s22  ;;  %s628_s13 = sshra.s32 %s221_s9, 4  ;;  %s629_s13 = int_to_ptr.hbm [resolvable:$true] %s628_s13 }
  0x1d   : > { %s630_s14 = scalar_lea.hbm %s629_s13, 8  ;;  %p632_p9 = pneg %p847_p7 }
  0x1e   : > { %p631_p8 = scmp.ne.s32.totalorder %s629_s13, %s630_s14  ;;  %s635_s29 = scalar_lea.hbm %s918_s0, 16 }
  0x1f   : > { %p636_p11 = scmp.lt.s32.totalorder %s629_s13, %s918_s0  ;;  %p637_p0 = scmp.lt.s32.totalorder %s635_s29, %s630_s14 }
  0x20   : > { %p633_p10 = pnand %p632_p9, %p631_p8 }
  0x21   : > { %p638_p2 = por %p637_p0, %p636_p11 }
  0x22   : > { %p634_p13 = pneg %p633_p10 }
  0x24   : > { %p639_p5 = pnand %p638_p2, %p634_p13 }
  0x26   : > { %642 = shalt.err (!%p639_p5)
}
  0x27   : > { %519 = dma.hbm_to_vmem [thread:$0]  (!%p847_p7), %s221_s9, 128, %s223_s8, %s211_s11  }
  0x28   : > { %231 = sbr.rel (%p793_p3) target bundleno = 322 (0x142), region = 40  ;;  %s864_s22 = sand.u32 (!%p793_p3), 1, %s720_s19  }
  0x29   : > { %s467_s6 = sshll.u32 (!%p793_p3), %s864_s22, 3  ;;  %s234_s7 = scalar_lea.sflag (!%p793_p3), [#allocation3], %s864_s22 }
  0x2a   : > { %s237_s27 = scalar_lea.vmem (!%p793_p3), [#allocation2], %s467_s6 }
  0x2d   : > { %703 = dma.done.wait (%p826_p12), %s234_s7, 128  }
  0x2e   : > { %705 = vsyncadd (%p826_p12), %s234_s7, 4294967168 }
  0x2f   : > { %707 = dma.done.wait (%p43_p1), [#allocation6], 512  }
  0x30   : > { %709 = vsyncadd (%p43_p1), [#allocation6], 4294966784  ;;  %v494_v0 = vld [vmem:[#allocation5 + $0x8] sm:$0xff]  ;;  %v493_v1 = vld [vmem:[#allocation5] sm:$0xff]  ;;  %vm298_vm0 = vcmask 261120   ;;  %s490_s8 = sshll.u32 %s788_s25, 3 }
  0x31   : > { %308 = vmatpush.bf16.msra.mxu0 %v494_v0  ;;  %v276_v2 = vld [vmem:[%s237_s27] sm:$0xff]  ;;  %s365_s11 = scalar_lea.hbm %s923_s5, %s490_s8  ;;  %s274_s28 = scalar_lea.vmem [#allocation8], %s467_s6 }
  0x32   : > { %v277_v3 = vpack.c.bf16 %v276_v2, %v276_v2  ;;  %v496_v4 = vld [vmem:[#allocation7 + $0x8] sm:$0xff]  ;;  %v495_v5 = vld [vmem:[#allocation7] sm:$0xff]  ;;  %s367_s29 = sshll.u32 %s274_s28, 4  ;;  %s369_s30 = sshll.u32 %s365_s11, 4  ;;  %s368_s29 = int_to_ptr.vmem [resolvable:$true] %s367_s29  ;;  %s370_s30 = int_to_ptr.hbm [resolvable:$true] %s369_s30 }
  0x33   : > { %346 = vmatpush.bf16.msra.mxu1 %v496_v4  ;;  %v566_v6 = vld [vmem:[%s920_s2] ss:$0 sm:$0xff]  ;;  %s355_s16 = scalar_lea.sflag [#allocation4], %s864_s22  ;;  %s672_s25 = sshra.s32 %s370_s30, 4  ;;  %s673_s25 = int_to_ptr.hbm [resolvable:$true] %s672_s25 }
  0x34   : > { %v567_v12 = vld [vmem:[%s922_s4] ss:$0 sm:$0xff]  ;;  %s674_s7 = scalar_lea.hbm %s673_s25, 8  ;;  %s678_s6 = scalar_lea.hbm %s923_s5, 16 }
  0x35   : > { %309 = vmatpush.bf16.msra.mxu0 %v493_v1  ;;  %p675_p1 = scmp.ne.s32.totalorder %s673_s25, %s674_s7  ;;  %p679_p12 = scmp.lt.s32.totalorder %s673_s25, %s923_s5 }
  0x36   : > { %p680_p7 = scmp.lt.s32.totalorder %s678_s6, %s674_s7 }
  0x37   : > { %347 = vmatpush.bf16.msra.mxu1 %v495_v5  ;;  %p676_p3 = pnand %p675_p1, %p833_p4 }
  0x38   : > { %479 = vmatmul.msk.bf16.vlgmr.msra.gmra.mxu0 %vm298_vm0, %v277_v3  ;;  %p681_p8 = por %p680_p7, %p679_p12 }
  0x39   : > { %p677_p5 = pneg %p676_p3 }
  0x3b   : > { %p682_p9 = pnand %p681_p8, %p677_p5 }
  0xb5   : > { %v311_v7 = vpop.f32.mrf.mxu0 }
  0xb6   : > { %v312_v8 = vadd.f32 %v566_v6, %v311_v7 }
  0xb8   : > { %v315_v9 = vmax.f32 %v312_v8, 0.0 }
  0xba   : > { %v316_v10 = vpack.c.bf16 %v315_v9, %v315_v9 }
  0xbc   : > { %488 = vmatmul.msk.bf16.vlgmr.msra.gmra.mxu1 %vm298_vm0, %v316_v10 }
  0xbd   : > { %v313_v11 = vpop.f32.mrf.mxu0 }
 0x139   : > { %v349_v13 = vpop.f32.mrf.mxu1 }
 0x13a   : > { %v350_v14 = vadd.f32 %v567_v12, %v349_v13 }
 0x13c   : > { %353 = vst.msk [vmem:[%s274_s28] sm:$0xff] %vm298_vm0, %v350_v14 }
 0x13d   : > { %685 = shalt.err (!%p682_p9)
}
 0x13e   : > { %507 = dma.vmem_to_hbm [thread:$0]  (%p833_p4), %s368_s29, 128, %s370_s30, %s355_s16  }
 0x141   : > { %v351_v15 = vpop.f32.mrf.mxu1 }
 0x142 PF: > { %s381_s22 = sand.u32 1, %s716_s18   ;;  %p930_p10 = scmp.ge.s32.totalorder %s728_s21, 2 }
 0x143   : > { %s382_s9 = scalar_lea.sflag [#allocation4], %s381_s22 }
 0x144   : > { %p521_p13 = pnand %p930_p10, %p837_p6 }
 0x146   : > { %p522_p11 = pneg %p521_p13 }
 0x148   : > { %711 = dma.done.wait (%p522_p11), %s382_s9, 128  }
 0x149   : > { %713 = vsyncadd (%p522_p11), %s382_s9, 4294967168  ;;  %p19_p0 = scmp.ge.s32.totalorder %s807_s12, 4   ;;  %s931_s18 = smov %s720_s19 }
 0x14a   : > { %s932_s19 = smov %s724_s20  ;;  %s933_s20 = smov %s818_s15 }
 0x14b   : > { %s934_s21 = smov %s807_s12  ;;  %21 = sbr.rel (!%p19_p0) target bundleno = 6 (0x6), region = 93 }
 0x150   :  { %388 = vsyncpa [#allocation3], 1 }
 0x151   :  { %390 = vsyncpa [#allocation3 + $0x1], 1 }
 0x152   :  { %391 = vsyncpa [#allocation6], 1 }
 0x153   :  { %392 = vsyncpa [#allocation4], 1 }
 0x154   :  { %394 = vsyncpa [#allocation4 + $0x1], 1 }

</bundles_post_ra>
